<compile_context>
chip_gen: v5e
topology: v5e:2x2
jax: 0.10.0
libtpu: 0.0.40
codegen_flags: <defaults>
</compile_context>

<pallas_src>
import math
import functools

import jax
import jax.numpy as jnp
from jax.experimental import pallas as pl
from jax.experimental.pallas import tpu as pltpu


def _self_attention_kernel(x_ref, mask_ref, wqkv_ref, bqkv_ref, o_ref,
                           *, num_heads, head_dim):
    # x_ref:    (bb, S, H)  bf16 — batch block of hidden states
    # mask_ref: (bb, 1, S)  f32  — additive mask per batch element
    # wqkv_ref: (H, 3H)     bf16 — fused [Wq | Wk | Wv] (Wq pre-scaled by 1/sqrt(d))
    # bqkv_ref: (1, 3H)     f32  — fused [bq | bk | bv] (bq pre-scaled)
    # o_ref:    (bb, S, H)  f32
    H = num_heads * head_dim
    x = x_ref[...]                     # (bb, S, H) bf16
    mask = mask_ref[...]               # (bb, 1, S) f32

    # Fused QKV projection: one wide-N MXU pass, f32 accumulation, then a
    # single bf16 cast of the (bb, S, 3H) intermediate.
    qkv = jax.lax.dot_general(
        x, wqkv_ref[...],
        dimension_numbers=(((2,), (0,)), ((), ())),
        preferred_element_type=jnp.float32)            # (bb, S, 3H) f32
    qkv = (qkv + bqkv_ref[0]).astype(jnp.bfloat16)      # single cast

    q = qkv[..., :H]                  # already scaled by 1/sqrt(d)
    k = qkv[..., H:2 * H]
    v = qkv[..., 2 * H:]

    # Static per-head loop (see header note about moving heads to the grid for
    # production head_dim / seq_len).
    ctx_heads = []
    for h in range(num_heads):
        lo = h * head_dim
        hi = lo + head_dim
        qh = q[..., lo:hi]            # (bb, S, d) bf16
        kh = k[..., lo:hi]
        vh = v[..., lo:hi]

        # q @ k^T contracting the last dims (no explicit transpose/relayout).
        scores = jnp.einsum('bqd,bkd->bqk', qh, kh,
                            preferred_element_type=jnp.float32)   # (bb,S,S) f32
        # Sublane-broadcast add of the (bb, 1, S) mask row — no (S, S) mask
        # tile is ever materialized.
        scores = scores + mask

        # Numerically-stable softmax numerator in f32.
        m = jnp.max(scores, axis=-1, keepdims=True)
        e = jnp.exp(scores - m)                                   # (bb,S,S) f32
        denom = jnp.sum(e, axis=-1, keepdims=True)                # (bb,S,1) f32

        # PV matmul on the UNNORMALIZED exp (bf16 MXU operands), then an exact
        # f32 divide on the (bb, S, d) context — ~S/d fewer element ops than
        # normalizing the (S, S) probs, and no approx-reciprocal error.
        ctx = jnp.einsum('bqk,bkd->bqd', e.astype(jnp.bfloat16), vh,
                         preferred_element_type=jnp.float32)      # (bb,S,d) f32
        ctx_heads.append(ctx / denom)

    # Single lane-dense (bb, S, H) store of the concatenated head contexts.
    o_ref[...] = jnp.concatenate(ctx_heads, axis=-1).astype(o_ref.dtype)


def bert_self_attention(hidden_states, attention_mask, params, num_heads,
                        *, batch_block=None):
    """hidden_states: (B, S, H) f32; attention_mask: (B, 1, 1, S) f32 additive."""
    B, S, H = hidden_states.shape
    assert H % num_heads == 0
    head_dim = H // num_heads
    scale = 1.0 / math.sqrt(head_dim)

    # At toy shapes, fold the whole batch into one grid step (two sequential
    # grid steps on one TC would be pure per-step overhead).
    if batch_block is None:
        batch_block = B
    assert B % batch_block == 0
    grid = (B // batch_block,)

    # Collapse the broadcast dims of the mask: (B, 1, 1, S) -> (B, 1, S).
    mask = attention_mask.reshape(B, 1, S).astype(jnp.float32)

    # Fuse Q/K/V into one (H, 3H) weight / (1, 3H) bias.  Fold the 1/sqrt(d)
    # score scaling into the query weight+bias so the kernel never scales.
    wqkv = jnp.concatenate(
        [params["wq"] * scale, params["wk"], params["wv"]], axis=1
    ).astype(jnp.bfloat16)                               # (H, 3H) bf16
    bqkv = jnp.concatenate(
        [params["bq"] * scale, params["bk"], params["bv"]]
    ).reshape(1, 3 * H).astype(jnp.float32)              # (1, 3H) f32

    x = hidden_states.astype(jnp.bfloat16)

    kernel = functools.partial(_self_attention_kernel,
                               num_heads=num_heads, head_dim=head_dim)

    # Weight/bias blocks are constant across the grid (fetched once; the
    # pipeliner detects the unchanged block index and skips re-DMA).  On v7x
    # with many grid steps, mark them pl.Buffered(1) to reclaim the second
    # VMEM copy.
    weight_spec = pl.BlockSpec((H, 3 * H), lambda b: (0, 0))
    bias_spec = pl.BlockSpec((1, 3 * H), lambda b: (0, 0))

    out = pl.pallas_call(
        kernel,
        out_shape=jax.ShapeDtypeStruct((B, S, H), jnp.float32),
        grid_spec=pltpu.PrefetchScalarGridSpec(
            num_scalar_prefetch=0,
            grid=grid,
            in_specs=[
                pl.BlockSpec((batch_block, S, H), lambda b: (b, 0, 0)),  # x
                pl.BlockSpec((batch_block, 1, S), lambda b: (b, 0, 0)),  # mask
                weight_spec,                                             # W_qkv
                bias_spec,                                               # b_qkv
            ],
            out_specs=pl.BlockSpec((batch_block, S, H), lambda b: (b, 0, 0)),
        ),
        compiler_params=pltpu.CompilerParams(
            dimension_semantics=("parallel",),
            # Load-bearing on v5e (16 MiB default scoped VMEM); safe on v7x.
            vmem_limit_bytes=32 * 1024 * 1024,
        ),
    )(x, mask, wqkv, bqkv)
    return out


def _reference(hidden_states, attention_mask, params, num_heads):
    """Pure-JAX f32 reference matching the PyTorch forward (eval mode)."""
    B, S, H = hidden_states.shape
    d = H // num_heads
    q = hidden_states @ params["wq"] + params["bq"]
    k = hidden_states @ params["wk"] + params["bk"]
    v = hidden_states @ params["wv"] + params["bv"]

    def split(t):  # (B, S, H) -> (B, heads, S, d)
        return t.reshape(B, S, num_heads, d).transpose(0, 2, 1, 3)

    q, k, v = split(q), split(k), split(v)
    scores = jnp.einsum("bhqd,bhkd->bhqk", q, k) / math.sqrt(d)
    scores = scores + attention_mask  # (B,1,1,S) broadcasts
    probs = jax.nn.softmax(scores, axis=-1)
    ctx = jnp.einsum("bhqk,bhkd->bhqd", probs, v)
    return ctx.transpose(0, 2, 1, 3).reshape(B, S, H)


if __name__ == "__main__":
    # Small BERT-like config.
    B, S, H, num_heads = 2, 8, 32, 4

    key = jax.random.PRNGKey(0)
    k_x, k_m, k_wq, k_bq, k_wk, k_bk, k_wv, k_bv = jax.random.split(key, 8)

    hidden_states = jax.random.normal(k_x, (B, S, H), dtype=jnp.float32)
    # Standard additive mask: 0 for visible, -10000 for masked-out positions.
    visible = (jax.random.uniform(k_m, (B, 1, 1, S)) > 0.2).astype(jnp.float32)
    attention_mask = (1.0 - visible) * -10000.0

    # nn.Linear weight is (out, in); we store it transposed so y = x @ W + b
    # matches y = x @ weight.T + bias.
    init_scale = 1.0 / math.sqrt(H)
    params = {
        "wq": jax.random.uniform(k_wq, (H, H), minval=-init_scale, maxval=init_scale),
        "bq": jax.random.uniform(k_bq, (H,), minval=-init_scale, maxval=init_scale),
        "wk": jax.random.uniform(k_wk, (H, H), minval=-init_scale, maxval=init_scale),
        "bk": jax.random.uniform(k_bk, (H,), minval=-init_scale, maxval=init_scale),
        "wv": jax.random.uniform(k_wv, (H, H), minval=-init_scale, maxval=init_scale),
        "bv": jax.random.uniform(k_bv, (H,), minval=-init_scale, maxval=init_scale),
    }

    out = bert_self_attention(hidden_states, attention_mask, params, num_heads)
    out = jax.block_until_ready(out)

    ref = _reference(hidden_states, attention_mask, params, num_heads)
    assert out.shape == (B, S, H)
    # bf16 MXU operands (activations / fused weights / exp numerator) vs the
    # f32 reference; softmax division itself is now exact f32.
    assert jnp.allclose(out, ref, atol=3e-2, rtol=3e-2), "mismatch vs reference"

    print("KERNEL_OK")
</pallas_src>

<mosaic_0001>
module attributes {stable_mosaic.version = 11 : i64} {
  func.func @_self_attention_kernel(%arg0: i32, %arg1: memref<2x8x32xbf16, #tpu.memory_space<vmem>>, %arg2: memref<2x1x8xf32, #tpu.memory_space<vmem>>, %arg3: memref<32x96xbf16, #tpu.memory_space<vmem>>, %arg4: memref<1x96xf32, #tpu.memory_space<vmem>>, %arg5: memref<2x8x32xf32, #tpu.memory_space<vmem>>) attributes {dimension_semantics = [#tpu.dimension_semantics<parallel>], iteration_bounds = array<i64: 1>, scalar_prefetch = 0 : i64, scratch_operands = 0 : i64, tpu.core_type = #tpu.core_type<tc>, window_params = [{transform_indices = @transform_0, window_bounds = array<i64: 2, 8, 32>}, {transform_indices = @transform_1, window_bounds = array<i64: 2, 1, 8>}, {pipeline_mode = #tpu.pipeline_mode<synchronous>, transform_indices = @transform_2, window_bounds = array<i64: 32, 96>}, {pipeline_mode = #tpu.pipeline_mode<synchronous>, transform_indices = @transform_3, window_bounds = array<i64: 1, 96>}, {transform_indices = @transform_4, window_bounds = array<i64: 2, 8, 32>}]} {
    %c0 = arith.constant 0 : index
    %c0_0 = arith.constant 0 : index
    %c0_1 = arith.constant 0 : index
    %0 = vector.load %arg1[%c0, %c0_0, %c0_1] : memref<2x8x32xbf16, #tpu.memory_space<vmem>>, vector<2x8x32xbf16>
    %c0_2 = arith.constant 0 : index
    %c0_3 = arith.constant 0 : index
    %c0_4 = arith.constant 0 : index
    %1 = vector.load %arg2[%c0_2, %c0_3, %c0_4] : memref<2x1x8xf32, #tpu.memory_space<vmem>>, vector<2x1x8xf32>
    %c0_5 = arith.constant 0 : index
    %c0_6 = arith.constant 0 : index
    %2 = vector.load %arg3[%c0_5, %c0_6] : memref<32x96xbf16, #tpu.memory_space<vmem>>, vector<32x96xbf16>
    %cst = arith.constant dense<0.000000e+00> : vector<2x8x96xf32>
    %3 = tpu.matmul %0, %2, %cst {dimension_numbers = #tpu.dot_dimension_numbers<[2], [0], [0, 1], [1], [0, 0, 0, 1, 1, 1], [], []>} : vector<2x8x32xbf16>, vector<32x96xbf16>, vector<2x8x96xf32> -> vector<2x8x96xf32>
    %c0_7 = arith.constant 0 : index
    %c0_8 = arith.constant 0 : index
    %4 = vector.load %arg4[%c0_7, %c0_8] : memref<1x96xf32, #tpu.memory_space<vmem>>, vector<1x96xf32>
    %5 = vector.shape_cast %4 : vector<1x96xf32> to vector<96xf32>
    %6 = vector.shape_cast %5 : vector<96xf32> to vector<1x1x96xf32>
    %7 = vector.broadcast %6 : vector<1x1x96xf32> to vector<2x8x96xf32>
    %8 = arith.addf %3, %7 : vector<2x8x96xf32>
    %9 = arith.truncf %8 : vector<2x8x96xf32> to vector<2x8x96xbf16>
    %10 = vector.extract_strided_slice %9 {offsets = [0, 0, 0], sizes = [2, 8, 32], strides = [1, 1, 1]} : vector<2x8x96xbf16> to vector<2x8x32xbf16>
    %11 = vector.extract_strided_slice %9 {offsets = [0, 0, 32], sizes = [2, 8, 32], strides = [1, 1, 1]} : vector<2x8x96xbf16> to vector<2x8x32xbf16>
    %12 = vector.extract_strided_slice %9 {offsets = [0, 0, 64], sizes = [2, 8, 32], strides = [1, 1, 1]} : vector<2x8x96xbf16> to vector<2x8x32xbf16>
    %13 = vector.extract_strided_slice %10 {offsets = [0, 0, 0], sizes = [2, 8, 8], strides = [1, 1, 1]} : vector<2x8x32xbf16> to vector<2x8x8xbf16>
    %14 = vector.extract_strided_slice %11 {offsets = [0, 0, 0], sizes = [2, 8, 8], strides = [1, 1, 1]} : vector<2x8x32xbf16> to vector<2x8x8xbf16>
    %15 = vector.extract_strided_slice %12 {offsets = [0, 0, 0], sizes = [2, 8, 8], strides = [1, 1, 1]} : vector<2x8x32xbf16> to vector<2x8x8xbf16>
    "tpu.trace_start"() <{level = 10 : i32, message = "bqd,bkd->bqk"}> : () -> ()
    %cst_9 = arith.constant dense<0.000000e+00> : vector<2x8x8xf32>
    %16 = tpu.matmul %13, %14, %cst_9 {dimension_numbers = #tpu.dot_dimension_numbers<[2], [2], [1], [1], [0, 0, 0, 1, 1, 1], [0], [0]>} : vector<2x8x8xbf16>, vector<2x8x8xbf16>, vector<2x8x8xf32> -> vector<2x8x8xf32>
    "tpu.trace_stop"() : () -> ()
    %17 = vector.broadcast %1 : vector<2x1x8xf32> to vector<2x8x8xf32>
    %18 = arith.addf %16, %17 : vector<2x8x8xf32>
    %cst_10 = arith.constant dense<0xFF800000> : vector<2x8xf32>
    %19 = vector.multi_reduction <maximumf>, %18, %cst_10 [2] : vector<2x8x8xf32> to vector<2x8xf32>
    %20 = vector.shape_cast %19 : vector<2x8xf32> to vector<2x8x1xf32>
    %21 = vector.broadcast %20 : vector<2x8x1xf32> to vector<2x8x8xf32>
    %22 = arith.subf %18, %21 : vector<2x8x8xf32>
    %23 = math.exp %22 : vector<2x8x8xf32>
    %cst_11 = arith.constant dense<0.000000e+00> : vector<2x8xf32>
    %24 = vector.multi_reduction <add>, %23, %cst_11 [2] : vector<2x8x8xf32> to vector<2x8xf32>
    %25 = vector.shape_cast %24 : vector<2x8xf32> to vector<2x8x1xf32>
    %26 = arith.truncf %23 : vector<2x8x8xf32> to vector<2x8x8xbf16>
    "tpu.trace_start"() <{level = 10 : i32, message = "bqk,bkd->bqd"}> : () -> ()
    %cst_12 = arith.constant dense<0.000000e+00> : vector<2x8x8xf32>
    %27 = tpu.matmul %26, %15, %cst_12 {dimension_numbers = #tpu.dot_dimension_numbers<[2], [1], [1], [2], [0, 0, 0, 1, 1, 2], [0], [0]>} : vector<2x8x8xbf16>, vector<2x8x8xbf16>, vector<2x8x8xf32> -> vector<2x8x8xf32>
    "tpu.trace_stop"() : () -> ()
    %28 = vector.broadcast %25 : vector<2x8x1xf32> to vector<2x8x8xf32>
    %29 = arith.divf %27, %28 : vector<2x8x8xf32>
    %30 = vector.extract_strided_slice %10 {offsets = [0, 0, 8], sizes = [2, 8, 8], strides = [1, 1, 1]} : vector<2x8x32xbf16> to vector<2x8x8xbf16>
    %31 = vector.extract_strided_slice %11 {offsets = [0, 0, 8], sizes = [2, 8, 8], strides = [1, 1, 1]} : vector<2x8x32xbf16> to vector<2x8x8xbf16>
    %32 = vector.extract_strided_slice %12 {offsets = [0, 0, 8], sizes = [2, 8, 8], strides = [1, 1, 1]} : vector<2x8x32xbf16> to vector<2x8x8xbf16>
    "tpu.trace_start"() <{level = 10 : i32, message = "bqd,bkd->bqk"}> : () -> ()
    %cst_13 = arith.constant dense<0.000000e+00> : vector<2x8x8xf32>
    %33 = tpu.matmul %30, %31, %cst_13 {dimension_numbers = #tpu.dot_dimension_numbers<[2], [2], [1], [1], [0, 0, 0, 1, 1, 1], [0], [0]>} : vector<2x8x8xbf16>, vector<2x8x8xbf16>, vector<2x8x8xf32> -> vector<2x8x8xf32>
    "tpu.trace_stop"() : () -> ()
    %34 = vector.broadcast %1 : vector<2x1x8xf32> to vector<2x8x8xf32>
    %35 = arith.addf %33, %34 : vector<2x8x8xf32>
    %cst_14 = arith.constant dense<0xFF800000> : vector<2x8xf32>
    %36 = vector.multi_reduction <maximumf>, %35, %cst_14 [2] : vector<2x8x8xf32> to vector<2x8xf32>
    %37 = vector.shape_cast %36 : vector<2x8xf32> to vector<2x8x1xf32>
    %38 = vector.broadcast %37 : vector<2x8x1xf32> to vector<2x8x8xf32>
    %39 = arith.subf %35, %38 : vector<2x8x8xf32>
    %40 = math.exp %39 : vector<2x8x8xf32>
    %cst_15 = arith.constant dense<0.000000e+00> : vector<2x8xf32>
    %41 = vector.multi_reduction <add>, %40, %cst_15 [2] : vector<2x8x8xf32> to vector<2x8xf32>
    %42 = vector.shape_cast %41 : vector<2x8xf32> to vector<2x8x1xf32>
    %43 = arith.truncf %40 : vector<2x8x8xf32> to vector<2x8x8xbf16>
    "tpu.trace_start"() <{level = 10 : i32, message = "bqk,bkd->bqd"}> : () -> ()
    %cst_16 = arith.constant dense<0.000000e+00> : vector<2x8x8xf32>
    %44 = tpu.matmul %43, %32, %cst_16 {dimension_numbers = #tpu.dot_dimension_numbers<[2], [1], [1], [2], [0, 0, 0, 1, 1, 2], [0], [0]>} : vector<2x8x8xbf16>, vector<2x8x8xbf16>, vector<2x8x8xf32> -> vector<2x8x8xf32>
    "tpu.trace_stop"() : () -> ()
    %45 = vector.broadcast %42 : vector<2x8x1xf32> to vector<2x8x8xf32>
    %46 = arith.divf %44, %45 : vector<2x8x8xf32>
    %47 = vector.extract_strided_slice %10 {offsets = [0, 0, 16], sizes = [2, 8, 8], strides = [1, 1, 1]} : vector<2x8x32xbf16> to vector<2x8x8xbf16>
    %48 = vector.extract_strided_slice %11 {offsets = [0, 0, 16], sizes = [2, 8, 8], strides = [1, 1, 1]} : vector<2x8x32xbf16> to vector<2x8x8xbf16>
    %49 = vector.extract_strided_slice %12 {offsets = [0, 0, 16], sizes = [2, 8, 8], strides = [1, 1, 1]} : vector<2x8x32xbf16> to vector<2x8x8xbf16>
    "tpu.trace_start"() <{level = 10 : i32, message = "bqd,bkd->bqk"}> : () -> ()
    %cst_17 = arith.constant dense<0.000000e+00> : vector<2x8x8xf32>
    %50 = tpu.matmul %47, %48, %cst_17 {dimension_numbers = #tpu.dot_dimension_numbers<[2], [2], [1], [1], [0, 0, 0, 1, 1, 1], [0], [0]>} : vector<2x8x8xbf16>, vector<2x8x8xbf16>, vector<2x8x8xf32> -> vector<2x8x8xf32>
    "tpu.trace_stop"() : () -> ()
    %51 = vector.broadcast %1 : vector<2x1x8xf32> to vector<2x8x8xf32>
    %52 = arith.addf %50, %51 : vector<2x8x8xf32>
    %cst_18 = arith.constant dense<0xFF800000> : vector<2x8xf32>
    %53 = vector.multi_reduction <maximumf>, %52, %cst_18 [2] : vector<2x8x8xf32> to vector<2x8xf32>
    %54 = vector.shape_cast %53 : vector<2x8xf32> to vector<2x8x1xf32>
    %55 = vector.broadcast %54 : vector<2x8x1xf32> to vector<2x8x8xf32>
    %56 = arith.subf %52, %55 : vector<2x8x8xf32>
    %57 = math.exp %56 : vector<2x8x8xf32>
    %cst_19 = arith.constant dense<0.000000e+00> : vector<2x8xf32>
    %58 = vector.multi_reduction <add>, %57, %cst_19 [2] : vector<2x8x8xf32> to vector<2x8xf32>
    %59 = vector.shape_cast %58 : vector<2x8xf32> to vector<2x8x1xf32>
    %60 = arith.truncf %57 : vector<2x8x8xf32> to vector<2x8x8xbf16>
    "tpu.trace_start"() <{level = 10 : i32, message = "bqk,bkd->bqd"}> : () -> ()
    %cst_20 = arith.constant dense<0.000000e+00> : vector<2x8x8xf32>
    %61 = tpu.matmul %60, %49, %cst_20 {dimension_numbers = #tpu.dot_dimension_numbers<[2], [1], [1], [2], [0, 0, 0, 1, 1, 2], [0], [0]>} : vector<2x8x8xbf16>, vector<2x8x8xbf16>, vector<2x8x8xf32> -> vector<2x8x8xf32>
    "tpu.trace_stop"() : () -> ()
    %62 = vector.broadcast %59 : vector<2x8x1xf32> to vector<2x8x8xf32>
    %63 = arith.divf %61, %62 : vector<2x8x8xf32>
    %64 = vector.extract_strided_slice %10 {offsets = [0, 0, 24], sizes = [2, 8, 8], strides = [1, 1, 1]} : vector<2x8x32xbf16> to vector<2x8x8xbf16>
    %65 = vector.extract_strided_slice %11 {offsets = [0, 0, 24], sizes = [2, 8, 8], strides = [1, 1, 1]} : vector<2x8x32xbf16> to vector<2x8x8xbf16>
    %66 = vector.extract_strided_slice %12 {offsets = [0, 0, 24], sizes = [2, 8, 8], strides = [1, 1, 1]} : vector<2x8x32xbf16> to vector<2x8x8xbf16>
    "tpu.trace_start"() <{level = 10 : i32, message = "bqd,bkd->bqk"}> : () -> ()
    %cst_21 = arith.constant dense<0.000000e+00> : vector<2x8x8xf32>
    %67 = tpu.matmul %64, %65, %cst_21 {dimension_numbers = #tpu.dot_dimension_numbers<[2], [2], [1], [1], [0, 0, 0, 1, 1, 1], [0], [0]>} : vector<2x8x8xbf16>, vector<2x8x8xbf16>, vector<2x8x8xf32> -> vector<2x8x8xf32>
    "tpu.trace_stop"() : () -> ()
    %68 = vector.broadcast %1 : vector<2x1x8xf32> to vector<2x8x8xf32>
    %69 = arith.addf %67, %68 : vector<2x8x8xf32>
    %cst_22 = arith.constant dense<0xFF800000> : vector<2x8xf32>
    %70 = vector.multi_reduction <maximumf>, %69, %cst_22 [2] : vector<2x8x8xf32> to vector<2x8xf32>
    %71 = vector.shape_cast %70 : vector<2x8xf32> to vector<2x8x1xf32>
    %72 = vector.broadcast %71 : vector<2x8x1xf32> to vector<2x8x8xf32>
    %73 = arith.subf %69, %72 : vector<2x8x8xf32>
    %74 = math.exp %73 : vector<2x8x8xf32>
    %cst_23 = arith.constant dense<0.000000e+00> : vector<2x8xf32>
    %75 = vector.multi_reduction <add>, %74, %cst_23 [2] : vector<2x8x8xf32> to vector<2x8xf32>
    %76 = vector.shape_cast %75 : vector<2x8xf32> to vector<2x8x1xf32>
    %77 = arith.truncf %74 : vector<2x8x8xf32> to vector<2x8x8xbf16>
    "tpu.trace_start"() <{level = 10 : i32, message = "bqk,bkd->bqd"}> : () -> ()
    %cst_24 = arith.constant dense<0.000000e+00> : vector<2x8x8xf32>
    %78 = tpu.matmul %77, %66, %cst_24 {dimension_numbers = #tpu.dot_dimension_numbers<[2], [1], [1], [2], [0, 0, 0, 1, 1, 2], [0], [0]>} : vector<2x8x8xbf16>, vector<2x8x8xbf16>, vector<2x8x8xf32> -> vector<2x8x8xf32>
    "tpu.trace_stop"() : () -> ()
    %79 = vector.broadcast %76 : vector<2x8x1xf32> to vector<2x8x8xf32>
    %80 = arith.divf %78, %79 : vector<2x8x8xf32>
    %81 = tpu.concatenate %29, %46, %63, %80 in 2 : vector<2x8x8xf32>, vector<2x8x8xf32>, vector<2x8x8xf32>, vector<2x8x8xf32> -> vector<2x8x32xf32>
    %c0_25 = arith.constant 0 : index
    %c0_26 = arith.constant 0 : index
    %c0_27 = arith.constant 0 : index
    %82 = vector.load %arg5[%c0_25, %c0_26, %c0_27] : memref<2x8x32xf32, #tpu.memory_space<vmem>>, vector<2x8x32xf32>
    tpu.vector_store %arg5[%c0_25, %c0_26, %c0_27], %81 {strides = array<i32>} : memref<2x8x32xf32, #tpu.memory_space<vmem>>, vector<2x8x32xf32>,
    return
  }
  func.func @transform_0(%arg0: i32) -> (i32, i32, i32) {
    %c0_i32 = arith.constant 0 : i32
    %c0_i32_0 = arith.constant 0 : i32
    %c0_i32_1 = arith.constant 0 : i32
    return %arg0, %c0_i32, %c0_i32_0 : i32, i32, i32
  }
  func.func @transform_1(%arg0: i32) -> (i32, i32, i32) {
    %c0_i32 = arith.constant 0 : i32
    %c0_i32_0 = arith.constant 0 : i32
    %c0_i32_1 = arith.constant 0 : i32
    return %arg0, %c0_i32, %c0_i32_0 : i32, i32, i32
  }
  func.func @transform_2(%arg0: i32) -> (i32, i32) {
    %c0_i32 = arith.constant 0 : i32
    %c0_i32_0 = arith.constant 0 : i32
    %c0_i32_1 = arith.constant 0 : i32
    return %c0_i32, %c0_i32_0 : i32, i32
  }
  func.func @transform_3(%arg0: i32) -> (i32, i32) {
    %c0_i32 = arith.constant 0 : i32
    %c0_i32_0 = arith.constant 0 : i32
    %c0_i32_1 = arith.constant 0 : i32
    return %c0_i32, %c0_i32_0 : i32, i32
  }
  func.func @transform_4(%arg0: i32) -> (i32, i32, i32) {
    %c0_i32 = arith.constant 0 : i32
    %c0_i32_0 = arith.constant 0 : i32
    %c0_i32_1 = arith.constant 0 : i32
    return %arg0, %c0_i32, %c0_i32_0 : i32, i32, i32
  }
}

</mosaic_0001>

<bundles_post_ra>
// kernel: tpu_custom_call.1
= control target key start
LH: loop header
LB: loop body
LE: loop exit
PB: predicated region body
PF: predicated region fallthrough
CT: control target
= control target key end

     0   :  { %9 = vsyncpa [#allocation3], 0  ;;  %s1101_s0 = inlined_call_operand.hbm [shape: bf16[2,8,32], index: 0, kind: input, shape index: {}]   ;;  %s1102_s1 = inlined_call_operand.hbm [shape: f32[2,1,8], index: 1, kind: input, shape index: {}]   ;;  %s1103_s2 = inlined_call_operand.hbm [shape: bf16[32,96], index: 2, kind: input, shape index: {}]   ;;  %s1104_s3 = inlined_call_operand.vmem [shape: f32[1,96], index: 3, kind: input, shape index: {}]   ;;  %s1105_s4 = inlined_call_operand.hbm [shape: f32[2,8,32], index: 4, kind: output, shape index: {}]  }
   0x1   :  { %10 = vsyncpa [#allocation6], 0  ;;  %s29_s17 = sshll.u32 %s1102_s1, 4  ;;  %s30_s17 = int_to_ptr.hbm [resolvable:$true] %s29_s17 }
   0x2   :  { %11 = vsyncpa [#allocation4], 0  ;;  %s921_s18 = smov [#allocation5]   ;;  %s16_s22 = sshll.u32 %s1101_s0, 4  ;;  %s17_s22 = int_to_ptr.hbm [resolvable:$true] %s16_s22 }
   0x3   :  { %s31_s19 = sshll.u32 %s921_s18, 4  ;;  %s922_s23 = smov 16   ;;  %s32_s19 = int_to_ptr.vmem [resolvable:$true] %s31_s19 }
   0x4   :  { %s923_s24 = smov 1   ;;  %s924_s25 = smov [#allocation2]  }
   0x5   :  { %37 = dma.hbm_to_vmem [thread:$0]  %s30_s17, 32, %s32_s19, [#allocation6], %s922_s23, %s922_s23, %s923_s24  }
   0x6   :  { %s18_s26 = sshll.u32 %s924_s25, 4  ;;  %s925_s27 = smov 64   ;;  %s19_s26 = int_to_ptr.vmem [resolvable:$true] %s18_s26 }
   0x7   :  { %s926_s1 = smov 4   ;;  %s42_s30 = sshll.u32 %s1103_s2, 4  ;;  %s43_s30 = int_to_ptr.hbm [resolvable:$true] %s42_s30 }
   0x8   :  { %24 = dma.hbm_to_vmem [thread:$0]  %s17_s22, 128, %s19_s26, [#allocation3], %s925_s27, %s925_s27, %s926_s1  }
   0x9   :  { %s927_s0 = smov [#allocation7]  }
   0xa   :  { %s44_s5 = sshll.u32 %s927_s0, 4  ;;  %s45_s5 = int_to_ptr.vmem [resolvable:$true] %s44_s5 }
   0xb   :  { %50 = dma.hbm_to_vmem [thread:$0]  %s43_s30, 256, %s45_s5, [#allocation6], %s925_s27, %s925_s27, %s926_s1  }
   0xc   :  { %915 = dma.done.wait [#allocation3], 128  }
   0xd   :  { %916 = vsyncadd [#allocation3], 4294967168 }
   0xe   :  { %917 = dma.done.wait [#allocation6], 288  }
   0xf   :  { %918 = vsyncadd [#allocation6], 4294967008  ;;  %v762_v0 = vld [vmem:[#allocation7 + $0x8] sm:$0xff]  ;;  %v761_v1 = vld [vmem:[#allocation7] sm:$0xff]  ;;  %vm95_vm0 = vcmask 261120   ;;  %s928_s7 = smov 120  }
  0x10   :  { %105 = vmatpush.bf16.msra.mxu0 %v762_v0  ;;  %v760_v2 = vld [vmem:[#allocation2] sm:$0xff]  ;;  %s929_s8 = smov 88   ;;  %s930_s9 = smov 96   ;;  %vm126_vm1 = vcmask 64512   ;;  %vm195_vm2 = vcmask 1043456  }
  0x11   :  { %v784_v3 = vld [vmem:[%s1104_s3] ss:$0 sm:$0xff]  ;;  %s931_s3 = smov 112   ;;  %s932_s10 = smov 80   ;;  %v785_v40 = vld [vmem:[#allocation5] ss:$0 sm:$0xff] }
  0x12   :  { %s933_s11 = smov 72   ;;  %s934_s12 = smov 104   ;;  %v786_v49 = vld [vmem:[#allocation5 + $0x1] ss:$0 sm:$0xff] }
  0x13   :  { %s935_s13 = smov 56   ;;  %s936_s14 = smov 48  }
  0x14   :  { %106 = vmatpush.bf16.msra.mxu0 %v761_v1  ;;  %s937_s15 = smov 40   ;;  %s938_s16 = smov 8  }
  0x15   :  { %s939_s17 = smov 24   ;;  %s940_s18 = smov [#allocation8]  }
  0x16   :  { %s715_s19 = sshll.u32 %s940_s18, 4  ;;  %s717_s22 = sshll.u32 %s1105_s4, 4  ;;  %s716_s19 = int_to_ptr.vmem [resolvable:$true] %s715_s19  ;;  %s718_s22 = int_to_ptr.hbm [resolvable:$true] %s717_s22 }
  0x17   :  { %743 = vmatmul.msk.bf16.vlgmr.msra.gmra.mxu0 %vm95_vm0, %v760_v2 }
  0x94   :  { %v108_v4 = vpop.f32.mrf.mxu0 }
  0x95   :  { %v109_v5 = vadd.f32 %v784_v3, %v108_v4 }
  0x97   :  { %v113_v6 = vpack.c.bf16 %v109_v5, %v109_v5 }
  0x99   :  { %v122_v7 = vunpack.c.l.b16 %v113_v6 }
  0x9b   :  { %v986_v8 = vpack.c.b16 %v122_v7, %v122_v7 }
  0x9c   :  { %v110_v9 = vpop.f32.mrf.mxu0 }
  0x9d   :  { %v111_v10 = vadd.f32 %v784_v3, %v110_v9  ;;  %263 = vrot.lane.b32.xlu2 %v986_v8, %s928_s7  ;;  %265 = vrot.lane.b32.xlu1 %v986_v8, %s929_s8 }
  0x9e   :  { %124 = vrot.lane.b32.xlu0 %v986_v8, %s930_s9 }
  0x9f   :  { %v114_v11 = vpack.c.bf16 %v111_v10, %v111_v10 }
  0xa1   :  { %v147_v12 = vunpack.c.l.b16 %v114_v11 }
  0xa3   :  { %v991_v13 = vpack.c.b16 %v147_v12, %v147_v12 }
  0xa5   :  { %286 = vrot.lane.b32.xlu2 %v991_v13, %s928_s7  ;;  %288 = vrot.lane.b32.xlu1 %v991_v13, %s929_s8 }
  0xa6   :  { %149 = vrot.lane.b32.xlu0 %v991_v13, %s930_s9 }
  0xad   :  { %401 = vrot.lane.b32.xlu2 %v986_v8, %s931_s3  ;;  %426 = vrot.lane.b32.xlu1 %v991_v13, %s932_s10 }
  0xae   :  { %403 = vrot.lane.b32.xlu0 %v986_v8, %s932_s10 }
  0xb5   :  { %564 = vrot.lane.b32.xlu2 %v991_v13, %s933_s11  ;;  %541 = vrot.lane.b32.xlu1 %v986_v8, %s933_s11 }
  0xb6   :  { %424 = vrot.lane.b32.xlu0 %v991_v13, %s931_s3 }
  0xbd   :  { %562 = vrot.lane.b32.xlu1 %v991_v13, %s934_s12 }
  0xbe   :  { %539 = vrot.lane.b32.xlu0 %v986_v8, %s934_s12 }
  0xc5   :  { %350 = vrot.lane.b32.xlu1 %v991_v13, %s935_s13 }
  0xc6   :  { %190 = vrot.lane.b32.xlu0 %v986_v8, %s925_s27 }
  0xce   :  { %212 = vrot.lane.b32.xlu0 %v991_v13, %s925_s27 }
  0xf7   :  { %v264_v14 = vpop.permute.xlu2 %263 }
  0xff   :  { %v287_v19 = vpop.permute.xlu2 %286 }
 0x107   :  { %v402_v24 = vpop.permute.xlu2 %401 }
 0x10f   :  { %v266_v15 = vpop.permute.xlu1 %265  ;;  %v565_v29 = vpop.permute.xlu2 %564 }
 0x110   :  { %v125_v16 = vpop.permute.xlu0 %124  ;;  %v271_v17 = vsel %vm126_vm1, %v266_v15, 0  ;;  %v570_v33 = vsel %vm126_vm1, %v565_v29, 0 }
 0x111   :  { %v131_v18 = vsel %vm126_vm1, %v125_v16, 0  ;;  %280 = vmatpush.bf16.xpose.msrb.mxu0 %v271_v17 }
 0x112   :  { %140 = vmatpush.bf16.xpose.msra.mxu1 %v131_v18 }
 0x117   :  { %v289_v20 = vpop.permute.xlu1 %288 }
 0x118   :  { %v150_v21 = vpop.permute.xlu0 %149  ;;  %748 = vmatmul.msk.bf16.vlgmr.msrb.gmra.mxu0 %vm126_vm1, %v264_v14  ;;  %v294_v22 = vsel %vm126_vm1, %v289_v20, 0 }
 0x119   :  { %744 = vmatmul.msk.bf16.vlgmr.msra.gmra.mxu1 %vm126_vm1, %v113_v6  ;;  %v155_v23 = vsel %vm126_vm1, %v150_v21, 0 }
 0x11a   :  { %164 = vmatpush.bf16.xpose.msra.mxu2 %v155_v23  ;;  %303 = vmatpush.bf16.xpose.msrb.mxu1 %v294_v22 }
 0x11f   :  { %v427_v25 = vpop.permute.xlu1 %426 }
 0x120   :  { %v432_v26 = vsel %vm126_vm1, %v427_v25, 0  ;;  %v404_v27 = vpop.permute.xlu0 %403 }
 0x121   :  { %v409_v28 = vsel %vm126_vm1, %v404_v27, 0  ;;  %745 = vmatmul.msk.bf16.vlgmr.msra.gmra.mxu2 %vm126_vm1, %v114_v11 }
 0x122   :  { %441 = vmatpush.bf16.xpose.msra.mxu1 %v432_v26  ;;  %418 = vmatpush.bf16.xpose.msra.mxu0 %v409_v28 }
 0x127   :  { %v542_v30 = vpop.permute.xlu1 %541 }
 0x128   :  { %v547_v31 = vsel %vm126_vm1, %v542_v30, 0  ;;  %v425_v32 = vpop.permute.xlu0 %424 }
 0x129   :  { %749 = vmatmul.msk.bf16.vlgmr.msrb.gmra.mxu1 %vm126_vm1, %v287_v19  ;;  %752 = vmatmul.msk.bf16.vlgmr.msra.gmra.mxu0 %vm126_vm1, %v402_v24 }
 0x12a   :  { %579 = vmatpush.bf16.xpose.msrb.mxu1 %v570_v33  ;;  %556 = vmatpush.bf16.xpose.msrb.mxu0 %v547_v31 }
 0x12f   :  { %v563_v39 = vpop.permute.xlu1 %562 }
 0x130   :  { %v540_v34 = vpop.permute.xlu0 %539 }
 0x137   :  { %v351_v18 = vpop.permute.xlu1 %350 }
 0x138   :  { %v191_v35 = vpop.permute.xlu0 %190  ;;  %v356_v24 = vsel %vm195_vm2, %v351_v18, 0 }
 0x139   :  { %753 = vmatmul.msk.bf16.vlgmr.msra.gmra.mxu1 %vm126_vm1, %v425_v32  ;;  %756 = vmatmul.msk.bf16.vlgmr.msrb.gmra.mxu0 %vm126_vm1, %v540_v34  ;;  %v197_v36 = vsel %vm195_vm2, %v191_v35, 0 }
 0x13a   :  { %206 = vmatpush.bf16.msra.mxu3 %v197_v36 }
 0x140   :  { %v213_v37 = vpop.permute.xlu0 %212 }
 0x141   :  { %v218_v38 = vsel %vm195_vm2, %v213_v37, 0 }
 0x142   :  { %227 = vmatpush.bf16.msrb.mxu3 %v218_v38 }
 0x149   :  { %757 = vmatmul.msk.bf16.vlgmr.msrb.gmra.mxu1 %vm126_vm1, %v563_v39 }
 0x195   :  { %v282_v41 = vpop.f32.mrf.mxu0 }
 0x196   :  { %v142_v42 = vpop.f32.mrf.mxu1  ;;  %v283_v43 = vadd.f32 %v785_v40, %v282_v41 }
 0x197   :  { %v143_v44 = vadd.f32 %v785_v40, %v142_v42 }
 0x198   :  { %v309_v45 = vsel %vm126_vm1, %v283_v43, -inf }
 0x199   :  { %310 = vmax.xlane.f32.xlu0 %v309_v45  ;;  %v170_v46 = vsel %vm126_vm1, %v143_v44, -inf }
 0x19a   :  { %171 = vmax.xlane.f32.xlu2 %v170_v46 }
 0x19d   :  { %v284_v47 = vpop.f32.mrf.mxu0 }
 0x19e   :  { %v144_v48 = vpop.f32.mrf.mxu1 }
 0x1a4   :  { %v166_v50 = vpop.f32.mrf.mxu2 }
 0x1a5   :  { %v167_v51 = vadd.f32 %v786_v49, %v166_v50 }
 0x1a6   :  { %v305_v52 = vpop.f32.mrf.mxu1  ;;  %v420_v53 = vpop.f32.mrf.mxu0 }
 0x1a7   :  { %v421_v54 = vadd.f32 %v785_v40, %v420_v53  ;;  %v173_v55 = vsel %vm126_vm1, %v167_v51, -inf  ;;  %v306_v2 = vadd.f32 %v786_v49, %v305_v52 }
 0x1a8   :  { %174 = vmax.xlane.f32.xlu1 %v173_v55 }
 0x1a9   :  { %v447_v56 = vsel %vm126_vm1, %v421_v54, -inf  ;;  %v312_v3 = vsel %vm126_vm1, %v306_v2, -inf }
 0x1aa   :  { %448 = vmax.xlane.f32.xlu0 %v447_v56 }
 0x1ac   :  { %v168_v57 = vpop.f32.mrf.mxu2 }
 0x1ae   :  { %v307_v58 = vpop.f32.mrf.mxu1  ;;  %v422_v59 = vpop.f32.mrf.mxu0 }
 0x1b2   :  { %329 = vrot.lane.b32.xlu2 %v986_v8, %s935_s13 }
 0x1b6   :  { %v443_v60 = vpop.f32.mrf.mxu1  ;;  %v558_v61 = vpop.f32.mrf.mxu0 }
 0x1b7   :  { %v1037_v4 = vadd.f32 %v786_v49, %v443_v60  ;;  %v1043_v7 = vadd.f32 %v785_v40, %v558_v61 }
 0x1b9   :  { %v450_v5 = vsel %vm126_vm1, %v1037_v4, -inf  ;;  %v585_v10 = vsel %vm126_vm1, %v1043_v7, -inf }
 0x1be   :  { %467 = vrot.lane.b32.xlu0 %v986_v8, %s936_s14  ;;  %v445_v62 = vpop.f32.mrf.mxu1  ;;  %v560_v63 = vpop.f32.mrf.mxu0 }
 0x1c1   :  { %488 = vrot.lane.b32.xlu1 %v991_v13, %s936_s14 }
 0x1c6   :  { %v581_v0 = vpop.f32.mrf.mxu1 }
 0x1c7   :  { %v1041_v6 = vadd.f32 %v786_v49, %v581_v0 }
 0x1c9   :  { %v588_v9 = vsel %vm126_vm1, %v1041_v6, -inf }
 0x1ce   :  { %v583_v1 = vpop.f32.mrf.mxu1 }
 0x1db   :  { %313 = vmax.xlane.f32.xlu2 %v312_v3 }
 0x1e3   :  { %451 = vmax.xlane.f32.xlu2 %v450_v5 }
 0x1e8   :  { %589 = vmax.xlane.f32.xlu0 %v588_v9 }
 0x1eb   :  { %586 = vmax.xlane.f32.xlu1 %v585_v10 }
 0x1fb   :  { %605 = vrot.lane.b32.xlu2 %v986_v8, %s937_s15 }
 0x204   :  { %626 = vrot.lane.b32.xlu1 %v991_v13, %s937_s15 }
 0x20c   :  { %v311_v11 = vpop.xlane.xlu0 %310 }
 0x20d   :  { %v172_v12 = vpop.xlane.xlu2 %171  ;;  %v315_v14 = vsub.f32 %v283_v43, %v311_v11 }
 0x20e   :  { %v176_v15 = vsub.f32 %v143_v44, %v172_v12 }
 0x20f   :  { %v317_v16 = vmul.f32 1.442695, %v315_v14 }
 0x210   :  { %v178_v17 = vmul.f32 1.442695, %v176_v15 }
 0x211   :  { %787 = vpow2.f32 %v317_v16 }
 0x212   :  { %789 = vpow2.f32 %v178_v17 }
 0x215   :  { %v330_v19 = vpop.permute.xlu2 %329 }
 0x216   :  { %v335_v20 = vsel %vm195_vm2, %v330_v19, 0 }
 0x217   :  { %v788_v21 = vpop.eup %787  ;;  %344 = vmatpush.bf16.msrb.mxu2 %v335_v20 }
 0x218   :  { %v1052_v22 = vpop.eup %789  ;;  %v321_v8 = vsel %vm126_vm1, %v788_v21, 0.0  ;;  %v327_v23 = vpack.c.bf16 %v788_v21, %v788_v21 }
 0x219   :  { %322 = vadd.xlane.f32.xlu0 %v321_v8  ;;  %v188_v13 = vpack.c.bf16 %v1052_v22, %v1052_v22 }
 0x21a   :  { %750 = vmatmul.msk.bf16.vlgmr.msrb.gmra.mxu2 %vm126_vm1, %v327_v23 }
 0x21b   :  { %v175_v25 = vpop.xlane.xlu1 %174  ;;  %746 = vmatmul.msk.bf16.vlgmr.msra.gmra.mxu3 %vm126_vm1, %v188_v13 }
 0x21c   :  { %v177_v26 = vsub.f32 %v167_v51, %v175_v25  ;;  %365 = vmatpush.bf16.msra.mxu3 %v356_v24 }
 0x21d   :  { %v449_v27 = vpop.xlane.xlu0 %448 }
 0x21e   :  { %v180_v28 = vmul.f32 1.442695, %v177_v26  ;;  %v453_v29 = vsub.f32 %v421_v54, %v449_v27 }
 0x220   :  { %791 = vpow2.f32 %v180_v28  ;;  %v455_v30 = vmul.f32 1.442695, %v453_v29 }
 0x222   :  { %793 = vpow2.f32 %v455_v30 }
 0x226   :  { %v792_v31 = vpop.eup %791 }
 0x227   :  { %v189_v34 = vpack.c.bf16 %v792_v31, %v792_v31  ;;  %v185_v5 = vsel %vm126_vm1, %v792_v31, 0.0 }
 0x228   :  { %v794_v32 = vpop.eup %793 }
 0x229   :  { %v459_v33 = vsel %vm126_vm1, %v794_v32, 0.0  ;;  %v465_v37 = vpack.c.bf16 %v794_v32, %v794_v32 }
 0x22a   :  { %460 = vadd.xlane.f32.xlu0 %v459_v33 }
 0x22b   :  { %747 = vmatmul.msk.bf16.vlgmr.msrb.gmra.mxu3 %vm126_vm1, %v189_v34 }
 0x230   :  { %v468_v35 = vpop.permute.xlu0 %467 }
 0x231   :  { %v473_v36 = vsel %vm195_vm2, %v468_v35, 0 }
 0x232   :  { %482 = vmatpush.bf16.msra.mxu2 %v473_v36 }
 0x233   :  { %v489_v38 = vpop.permute.xlu1 %488 }
 0x234   :  { %v494_v39 = vsel %vm195_vm2, %v489_v38, 0 }
 0x235   :  { %754 = vmatmul.msk.bf16.vlgmr.msra.gmra.mxu2 %vm126_vm1, %v465_v37  ;;  %503 = vmatpush.bf16.msrb.mxu3 %v494_v39 }
 0x24e   :  { %v314_v40 = vpop.xlane.xlu2 %313 }
 0x24f   :  { %v316_v41 = vsub.f32 %v306_v2, %v314_v40 }
 0x251   :  { %v319_v42 = vmul.f32 1.442695, %v316_v41 }
 0x253   :  { %795 = vpow2.f32 %v319_v42 }
 0x256   :  { %v452_v43 = vpop.xlane.xlu2 %451 }
 0x257   :  { %v454_v44 = vsub.f32 %v1037_v4, %v452_v43  ;;  %v182_v4 = vsel %vm126_vm1, %v1052_v22, 0.0 }
 0x259   :  { %v796_v45 = vpop.eup %795  ;;  %v457_v46 = vmul.f32 1.442695, %v454_v44 }
 0x25a   :  { %v328_v47 = vpack.c.bf16 %v796_v45, %v796_v45  ;;  %v324_v48 = vsel %vm126_vm1, %v796_v45, 0.0 }
 0x25b   :  { %797 = vpow2.f32 %v457_v46  ;;  %325 = vadd.xlane.f32.xlu2 %v324_v48  ;;  %v590_v49 = vpop.xlane.xlu0 %589 }
 0x25c   :  { %751 = vmatmul.msk.bf16.vlgmr.msra.gmra.mxu3 %vm126_vm1, %v328_v47  ;;  %v592_v55 = vsub.f32 %v1041_v6, %v590_v49 }
 0x25e   :  { %v606_v50 = vpop.permute.xlu2 %605  ;;  %v587_v51 = vpop.xlane.xlu1 %586  ;;  %v595_v58 = vmul.f32 1.442695, %v592_v55 }
 0x25f   :  { %v611_v52 = vsel %vm195_vm2, %v606_v50, 0  ;;  %v591_v53 = vsub.f32 %v1043_v7, %v587_v51 }
 0x260   :  { %620 = vmatpush.bf16.msrb.mxu2 %v611_v52 }
 0x261   :  { %v798_v54 = vpop.eup %797  ;;  %v593_v56 = vmul.f32 1.442695, %v591_v53 }
 0x262   :  { %v462_v57 = vsel %vm126_vm1, %v798_v54, 0.0  ;;  %v466_v60 = vpack.c.bf16 %v798_v54, %v798_v54 }
 0x263   :  { %799 = vpow2.f32 %v593_v56  ;;  %463 = vadd.xlane.f32.xlu1 %v462_v57 }
 0x264   :  { %801 = vpow2.f32 %v595_v58 }
 0x269   :  { %v800_v59 = vpop.eup %799 }
 0x26a   :  { %v603_v61 = vpack.c.bf16 %v800_v59, %v800_v59  ;;  %v597_v62 = vsel %vm126_vm1, %v800_v59, 0.0  ;;  %v802_v63 = vpop.eup %801 }
 0x26b   :  { %598 = vadd.xlane.f32.xlu0 %v597_v62  ;;  %v600_v0 = vsel %vm126_vm1, %v802_v63, 0.0  ;;  %v604_v3 = vpack.c.bf16 %v802_v63, %v802_v63 }
 0x26c   :  { %755 = vmatmul.msk.bf16.vlgmr.msrb.gmra.mxu3 %vm126_vm1, %v466_v60  ;;  %758 = vmatmul.msk.bf16.vlgmr.msrb.gmra.mxu2 %vm126_vm1, %v603_v61 }
 0x273   :  { %601 = vadd.xlane.f32.xlu0 %v600_v0 }
 0x276   :  { %v627_v1 = vpop.permute.xlu1 %626 }
 0x277   :  { %v632_v2 = vsel %vm195_vm2, %v627_v1, 0 }
 0x278   :  { %641 = vmatpush.bf16.msra.mxu3 %v632_v2 }
 0x27b   :  { %183 = vadd.xlane.f32.xlu0 %v182_v4 }
 0x27c   :  { %759 = vmatmul.msk.bf16.vlgmr.msra.gmra.mxu3 %vm126_vm1, %v604_v3 }
 0x283   :  { %186 = vadd.xlane.f32.xlu0 %v185_v5 }
 0x28c   :  { %v323_v6 = vpop.xlane.xlu0 %322 }
 0x28d   :  { %803 = vrcp.f32 %v323_v6  ;;  %v382_v11 = vand.u32 2147483648, %v323_v6  ;;  %v380_v14 = vand.u32 2147483647, %v323_v6  ;;  %vm376_vm4 = vweird.f32 %v323_v6 }
 0x28f   :  { %v383_v16 = vor.u32 1.1754944e-38, %v382_v11  ;;  %vm381_vm6 = vcmp.eq.f32.partialorder %v380_v14, 8.507059e+37 }
 0x293   :  { %v804_v7 = vpop.eup %803 }
 0x294   :  { %v372_v9 = vmul.f32 %v804_v7, %v323_v6  ;;  %vm377_vm3 = vweird.f32 %v804_v7 }
 0x295   :  { %vm378_vm5 = vmor %vm376_vm4, %vm377_vm3 }
 0x296   :  { %v373_v10 = vsub.f32 1.0, %v372_v9 }
 0x298   :  { %v374_v12 = vmul.f32 %v804_v7, %v373_v10 }
 0x29a   :  { %v375_v15 = vadd.f32 %v804_v7, %v374_v12 }
 0x29c   :  { %v379_v17 = vsel %vm378_vm5, %v804_v7, %v375_v15 }
 0x29d   :  { %v461_v18 = vpop.xlane.xlu0 %460  ;;  %v346_v19 = vpop.f32.mrf.mxu2  ;;  %v384_v20 = vsel %vm381_vm6, %v383_v16, %v379_v17 }
 0x29e   :  { %805 = vrcp.f32 %v461_v18  ;;  %v1081_v21 = vpop.f32.mrf.mxu3  ;;  %v385_v22 = vmul.f32 %v384_v20, %v346_v19  ;;  %v520_v29 = vand.u32 2147483648, %v461_v18  ;;  %vm514_vm8 = vweird.f32 %v461_v18 }
 0x29f   :  { %v518_v30 = vand.u32 2147483647, %v461_v18 }
 0x2a0   :  { %679 = vrot.lane.b32.xlu2 %v385_v22, %s938_s16  ;;  %v521_v33 = vor.u32 1.1754944e-38, %v520_v29 }
 0x2a1   :  { %vm519_vm10 = vcmp.eq.f32.partialorder %v518_v30, 8.507059e+37 }
 0x2a4   :  { %v806_v8 = vpop.eup %805 }
 0x2a5   :  { %v510_v23 = vmul.f32 %v806_v8, %v461_v18  ;;  %v348_v13 = vpop.f32.mrf.mxu2  ;;  %vm515_vm7 = vweird.f32 %v806_v8 }
 0x2a6   :  { %v210_v24 = vpop.f32.mrf.mxu3  ;;  %vm516_vm9 = vmor %vm514_vm8, %vm515_vm7 }
 0x2a7   :  { %v511_v25 = vsub.f32 1.0, %v510_v23 }
 0x2a9   :  { %v512_v26 = vmul.f32 %v806_v8, %v511_v25 }
 0x2ab   :  { %v513_v28 = vadd.f32 %v806_v8, %v512_v26 }
 0x2ad   :  { %v517_v31 = vsel %vm516_vm9, %v806_v8, %v513_v28 }
 0x2ae   :  { %v1084_v27 = vpop.f32.mrf.mxu3  ;;  %v522_v35 = vsel %vm519_vm10, %v521_v33, %v517_v31 }
 0x2b6   :  { %v231_v32 = vpop.f32.mrf.mxu3 }
 0x2b8   :  { %v484_v34 = vpop.f32.mrf.mxu2 }
 0x2b9   :  { %v523_v36 = vmul.f32 %v522_v35, %v484_v34 }
 0x2bb   :  { %687 = vrot.lane.b32.xlu1 %v523_v36, %s922_s23 }
 0x2c0   :  { %v486_v37 = vpop.f32.mrf.mxu2 }
 0x2ce   :  { %v326_v38 = vpop.xlane.xlu2 %325 }
 0x2cf   :  { %807 = vrcp.f32 %v326_v38  ;;  %v397_v43 = vand.u32 2147483648, %v326_v38  ;;  %v395_v45 = vand.u32 2147483647, %v326_v38  ;;  %vm391_vm12 = vweird.f32 %v326_v38 }
 0x2d1   :  { %v398_v48 = vor.u32 1.1754944e-38, %v397_v43  ;;  %vm396_vm14 = vcmp.eq.f32.partialorder %v395_v45, 8.507059e+37 }
 0x2d5   :  { %v808_v39 = vpop.eup %807 }
 0x2d6   :  { %v387_v40 = vmul.f32 %v808_v39, %v326_v38  ;;  %v464_v41 = vpop.xlane.xlu1 %463  ;;  %vm392_vm11 = vweird.f32 %v808_v39 }
 0x2d7   :  { %809 = vrcp.f32 %v464_v41  ;;  %vm393_vm13 = vmor %vm391_vm12, %vm392_vm11  ;;  %vm529_vm2 = vweird.f32 %v464_v41  ;;  %v535_v63 = vand.u32 2147483648, %v464_v41  ;;  %v533_v0 = vand.u32 2147483647, %v464_v41 }
 0x2d8   :  { %v388_v42 = vsub.f32 1.0, %v387_v40 }
 0x2d9   :  { %v536_v7 = vor.u32 1.1754944e-38, %v535_v63  ;;  %vm534_vm7 = vcmp.eq.f32.partialorder %v533_v0, 8.507059e+37 }
 0x2da   :  { %v389_v44 = vmul.f32 %v808_v39, %v388_v42 }
 0x2dc   :  { %v390_v46 = vadd.f32 %v808_v39, %v389_v44 }
 0x2dd   :  { %v810_v47 = vpop.eup %809 }
 0x2de   :  { %v525_v49 = vmul.f32 %v810_v47, %v464_v41  ;;  %v599_v50 = vpop.xlane.xlu0 %598  ;;  %v394_v51 = vsel %vm393_vm13, %v808_v39, %v390_v46  ;;  %vm530_vm15 = vweird.f32 %v810_v47 }
 0x2df   :  { %811 = vrcp.f32 %v599_v50  ;;  %v367_v52 = vpop.f32.mrf.mxu3  ;;  %v399_v53 = vsel %vm396_vm14, %v398_v48, %v394_v51  ;;  %v658_v2 = vand.u32 2147483648, %v599_v50  ;;  %vm531_vm4 = vmor %vm529_vm2, %vm530_vm15  ;;  %v656_v3 = vand.u32 2147483647, %v599_v50 }
 0x2e0   :  { %v526_v54 = vsub.f32 1.0, %v525_v49  ;;  %v400_v55 = vmul.f32 %v399_v53, %v367_v52  ;;  %vm652_vm5 = vweird.f32 %v599_v50 }
 0x2e1   :  { %v659_v11 = vor.u32 1.1754944e-38, %v658_v2  ;;  %vm657_vm8 = vcmp.eq.f32.partialorder %v656_v3, 8.507059e+37 }
 0x2e2   :  { %681 = vrot.lane.b32.xlu0 %v400_v55, %s938_s16  ;;  %v527_v56 = vmul.f32 %v810_v47, %v526_v54 }
 0x2e4   :  { %v528_v62 = vadd.f32 %v810_v47, %v527_v56 }
 0x2e5   :  { %v812_v57 = vpop.eup %811 }
 0x2e6   :  { %v648_v58 = vmul.f32 %v812_v57, %v599_v50  ;;  %v602_v59 = vpop.xlane.xlu0 %601  ;;  %vm653_vm3 = vweird.f32 %v812_v57  ;;  %v532_v4 = vsel %vm531_vm4, %v810_v47, %v528_v62 }
 0x2e7   :  { %813 = vrcp.f32 %v602_v59  ;;  %v369_v60 = vpop.f32.mrf.mxu3  ;;  %vm654_vm6 = vmor %vm652_vm5, %vm653_vm3  ;;  %v537_v14 = vsel %vm534_vm7, %v536_v7, %v532_v4  ;;  %v673_v13 = vand.u32 2147483648, %v602_v59  ;;  %vm667_vm10 = vweird.f32 %v602_v59 }
 0x2e8   :  { %v649_v61 = vsub.f32 1.0, %v648_v58  ;;  %v671_v24 = vand.u32 2147483647, %v602_v59  ;;  %vm703_vm7 = vcmask 130048  }
 0x2e9   :  { %v674_v26 = vor.u32 1.1754944e-38, %v673_v13 }
 0x2ea   :  { %v650_v1 = vmul.f32 %v812_v57, %v649_v61  ;;  %vm672_vm12 = vcmp.eq.f32.partialorder %v671_v24, 8.507059e+37 }
 0x2ec   :  { %v651_v5 = vadd.f32 %v812_v57, %v650_v1 }
 0x2ed   :  { %v814_v6 = vpop.eup %813 }
 0x2ee   :  { %v663_v9 = vmul.f32 %v814_v6, %v602_v59  ;;  %v655_v10 = vsel %vm654_vm6, %v812_v57, %v651_v5  ;;  %vm668_vm9 = vweird.f32 %v814_v6  ;;  %v184_v32 = vpop.xlane.xlu0 %183  ;;  %vm706_vm6 = vcmask 195584  }
 0x2ef   :  { %v505_v12 = vpop.f32.mrf.mxu3  ;;  %v622_v15 = vpop.f32.mrf.mxu2  ;;  %v660_v18 = vsel %vm657_vm8, %v659_v11, %v655_v10  ;;  %vm669_vm11 = vmor %vm667_vm10, %vm668_vm9  ;;  %v244_v52 = vand.u32 2147483648, %v184_v32  ;;  %vm238_vm4 = vweird.f32 %v184_v32  ;;  %v242_v54 = vand.u32 2147483647, %v184_v32 }
 0x2f0   :  { %v664_v16 = vsub.f32 1.0, %v663_v9  ;;  %v538_v17 = vmul.f32 %v537_v14, %v505_v12  ;;  %v661_v19 = vmul.f32 %v660_v18, %v622_v15 }
 0x2f1   :  { %v245_v57 = vor.u32 1.1754944e-38, %v244_v52  ;;  %vm243_vm8 = vcmp.eq.f32.partialorder %v242_v54, 8.507059e+37 }
 0x2f2   :  { %689 = vrot.lane.b32.xlu2 %v538_v17, %s922_s23  ;;  %695 = vrot.lane.b32.xlu0 %v661_v19, %s939_s17  ;;  %v665_v20 = vmul.f32 %v814_v6, %v664_v16  ;;  %s941_s23 = smov 128  }
 0x2f4   :  { %v666_v23 = vadd.f32 %v814_v6, %v665_v20 }
 0x2f6   :  { %v670_v25 = vsel %vm669_vm11, %v814_v6, %v666_v23  ;;  %v187_v33 = vpop.xlane.xlu0 %186 }
 0x2f7   :  { %v507_v22 = vpop.f32.mrf.mxu3  ;;  %v624_v8 = vpop.f32.mrf.mxu2  ;;  %v675_v29 = vsel %vm672_vm12, %v674_v26, %v670_v25  ;;  %815 = vrcp.f32 %v187_v33  ;;  %v259_v43 = vand.u32 2147483648, %v187_v33  ;;  %vm253_vm14 = vweird.f32 %v187_v33 }
 0x2f8   :  { %817 = vrcp.f32 %v184_v32  ;;  %v257_v44 = vand.u32 2147483647, %v187_v33 }
 0x2f9   :  { %v260_v47 = vor.u32 1.1754944e-38, %v259_v43 }
 0x2fa   :  { %v680_v40 = vpop.permute.xlu2 %679  ;;  %vm258_vm2 = vcmp.eq.f32.partialorder %v257_v44, 8.507059e+37 }
 0x2fd   :  { %v816_v34 = vpop.eup %815 }
 0x2fe   :  { %v249_v35 = vmul.f32 %v816_v34, %v187_v33  ;;  %v818_v37 = vpop.eup %817  ;;  %vm254_vm13 = vweird.f32 %v816_v34 }
 0x2ff   :  { %v643_v28 = vpop.f32.mrf.mxu3  ;;  %v234_v39 = vmul.f32 %v818_v37, %v184_v32  ;;  %vm255_vm15 = vmor %vm253_vm14, %vm254_vm13  ;;  %vm239_vm3 = vweird.f32 %v818_v37 }
 0x300   :  { %v676_v30 = vmul.f32 %v675_v29, %v643_v28  ;;  %v250_v36 = vsub.f32 1.0, %v249_v35  ;;  %vm240_vm5 = vmor %vm238_vm4, %vm239_vm3 }
 0x301   :  { %v235_v42 = vsub.f32 1.0, %v234_v39 }
 0x302   :  { %697 = vrot.lane.b32.xlu2 %v676_v30, %s939_s17  ;;  %v251_v38 = vmul.f32 %v816_v34, %v250_v36 }
 0x303   :  { %v236_v46 = vmul.f32 %v818_v37, %v235_v42 }
 0x304   :  { %v252_v41 = vadd.f32 %v816_v34, %v251_v38 }
 0x305   :  { %v237_v50 = vadd.f32 %v818_v37, %v236_v46 }
 0x306   :  { %v256_v45 = vsel %vm255_vm15, %v816_v34, %v252_v41 }
 0x307   :  { %v645_v31 = vpop.f32.mrf.mxu3  ;;  %v261_v49 = vsel %vm258_vm2, %v260_v47, %v256_v45  ;;  %v241_v56 = vsel %vm240_vm5, %v818_v37, %v237_v50 }
 0x308   :  { %v262_v53 = vmul.f32 %v261_v49, %v1084_v27  ;;  %v246_v60 = vsel %vm243_vm8, %v245_v57, %v241_v56 }
 0x309   :  { %v247_v62 = vmul.f32 %v246_v60, %v1081_v21 }
 0x30b   :  { %v701_v63 = vsel %vm126_vm1, %v247_v62, %v680_v40 }
 0x32d   :  { %v688_v27 = vpop.permute.xlu1 %687 }
 0x32e   :  { %v704_v0 = vsel %vm703_vm7, %v701_v63, %v688_v27 }
 0x34c   :  { %v690_v48 = vpop.permute.xlu2 %689 }
 0x354   :  { %v682_v51 = vpop.permute.xlu0 %681 }
 0x355   :  { %v702_v55 = vsel %vm126_vm1, %v262_v53, %v682_v51 }
 0x356   :  { %v705_v59 = vsel %vm703_vm7, %v702_v55, %v690_v48 }
 0x35c   :  { %v698_v58 = vpop.permute.xlu2 %697 }
 0x35d   :  { %v708_v61 = vsel %vm706_vm6, %v705_v59, %v698_v58 }
 0x35e   :  { %710 = vst.msk [vmem:[#allocation8 + $0x8] sm:$0xff] %vm95_vm0, %v708_v61 }
 0x364   :  { %v696_v1 = vpop.permute.xlu0 %695 }
 0x365   :  { %v707_v2 = vsel %vm706_vm6, %v704_v0, %v696_v1 }
 0x366   :  { %709 = vst.msk [vmem:[#allocation8] sm:$0xff] %vm95_vm0, %v707_v2 }
 0x367   :  { %723 = dma.vmem_to_hbm [thread:$0]  %s716_s19, 256, %s718_s22, [#allocation4], %s941_s23, %s941_s23, %s938_s16  }
 0x368   :  { %919 = dma.done.wait [#allocation4], 256  }
 0x369   :  { %920 = vsyncadd [#allocation4], 4294967040 }
 0x36a   :  { %728 = vsyncpa [#allocation3], 1 }
 0x36b   :  { %729 = vsyncpa [#allocation6], 1 }
 0x36c   :  { %730 = vsyncpa [#allocation4], 1 }

</bundles_post_ra>
